<compile_context>
chip_gen: v5e
topology: v5e:2x2
jax: 0.10.0
libtpu: 0.0.40
codegen_flags: <defaults>
</compile_context>

<pallas_src>
import functools
import math

import numpy as np
import jax
import jax.numpy as jnp
from jax.experimental import pallas as pl
from jax.experimental.pallas import tpu as pltpu


# ---------------------------------------------------------------------------
# Deterministic wavelet matrix construction.
# IDWT_2D.__init__ uses dec_lo / dec_hi *reversed*; for Haar:
#   dec_lo reversed -> [ 1/sqrt(2),  1/sqrt(2)]
#   dec_hi reversed -> [ 1/sqrt(2), -1/sqrt(2)]
# ---------------------------------------------------------------------------
_HAAR_BAND_LOW = [0.7071067811865476, 0.7071067811865476]
_HAAR_BAND_HIGH = [0.7071067811865476, -0.7071067811865476]


def build_idwt_matrices(input_height, input_width,
                        band_low=_HAAR_BAND_LOW, band_high=_HAAR_BAND_HIGH):
    """Exact numpy port of IDWT_2D.get_matrix()."""
    band_length = len(band_low)
    assert band_length % 2 == 0
    band_length_half = band_length // 2

    L1 = max(input_height, input_width)
    L = math.floor(L1 / 2)
    matrix_h = np.zeros((L, L1 + band_length - 2))
    matrix_g = np.zeros((L1 - L, L1 + band_length - 2))
    end = None if band_length_half == 1 else -band_length_half + 1

    index = 0
    for i in range(L):
        for j in range(band_length):
            matrix_h[i, index + j] = band_low[j]
        index += 2
    matrix_h_0 = matrix_h[0:math.floor(input_height / 2),
                          0:input_height + band_length - 2]
    matrix_h_1 = matrix_h[0:math.floor(input_width / 2),
                          0:input_width + band_length - 2]

    index = 0
    for i in range(L1 - L):
        for j in range(band_length):
            matrix_g[i, index + j] = band_high[j]
        index += 2
    matrix_g_0 = matrix_g[0:input_height - math.floor(input_height / 2),
                          0:input_height + band_length - 2]
    matrix_g_1 = matrix_g[0:input_width - math.floor(input_width / 2),
                          0:input_width + band_length - 2]

    matrix_h_0 = matrix_h_0[:, band_length_half - 1:end]
    matrix_h_1 = matrix_h_1[:, band_length_half - 1:end]
    matrix_h_1 = np.transpose(matrix_h_1)
    matrix_g_0 = matrix_g_0[:, band_length_half - 1:end]
    matrix_g_1 = matrix_g_1[:, band_length_half - 1:end]
    matrix_g_1 = np.transpose(matrix_g_1)

    return (matrix_h_0.astype(np.float32),   # matrix_low_0  : (H/2, H)
            matrix_h_1.astype(np.float32),   # matrix_low_1  : (W,  W/2)
            matrix_g_0.astype(np.float32),   # matrix_high_0 : (H-H/2, H)
            matrix_g_1.astype(np.float32))   # matrix_high_1 : (W, W-W/2)


# ---------------------------------------------------------------------------
# Pallas kernel: one grid step processes B images.
#   ll/lh/hl/hh : (B*H/2, W/2)  sub-band rows of B images, stacked
#   ml1t/mh1t   : (W/2, W)      M_L1^T / M_H1^T   (grid-invariant)
#   ml0/mh0     : (H/2, H)      M_L0   / M_H0     (grid-invariant)
#   out_ref     : (B*H, W)      reconstructed images
# ---------------------------------------------------------------------------
def idwt2d_kernel(ll_ref, lh_ref, hl_ref, hh_ref,
                  ml1t_ref, mh1t_ref, ml0_ref, mh0_ref,
                  out_ref, *, batch, height, width):
    half_h = height // 2
    ml1t = ml1t_ref[...]          # (W/2, W)
    mh1t = mh1t_ref[...]          # (W/2, W)
    ml0 = ml0_ref[...]            # (H/2, H)
    mh0 = mh0_ref[...]            # (H/2, H)

    # ---- Column (width) pass: all B images at once, half-K matmuls ---------
    #   L  = LL @ M_L1^T + LH @ M_H1^T     (B*H/2, W/2) @ (W/2, W) -> (B*H/2, W)
    #   Hc = HL @ M_L1^T + HH @ M_H1^T
    l_rows = (jnp.dot(ll_ref[...], ml1t, preferred_element_type=jnp.float32) +
              jnp.dot(lh_ref[...], mh1t, preferred_element_type=jnp.float32))
    h_rows = (jnp.dot(hl_ref[...], ml1t, preferred_element_type=jnp.float32) +
              jnp.dot(hh_ref[...], mh1t, preferred_element_type=jnp.float32))

    # ---- Row (height) pass as ONE big right-multiply on transposed data ----
    #   out[b] = M_L0^T @ L[b] + M_H0^T @ Hc[b]
    #   <=> out[b]^T = L[b]^T @ M_L0 + Hc[b]^T @ M_H0
    lt = jnp.swapaxes(l_rows.reshape(batch, half_h, width), -2, -1)   # (B, W, H/2)
    ht = jnp.swapaxes(h_rows.reshape(batch, half_h, width), -2, -1)
    lt = lt.reshape(batch * width, half_h)
    ht = ht.reshape(batch * width, half_h)
    out_t = (jnp.dot(lt, ml0, preferred_element_type=jnp.float32) +
             jnp.dot(ht, mh0, preferred_element_type=jnp.float32))    # (B*W, H)

    out = jnp.swapaxes(out_t.reshape(batch, width, height), -2, -1)   # (B, H, W)
    out_ref[...] = out.reshape(batch * height, width).astype(out_ref.dtype)


# ---------------------------------------------------------------------------
# VMEM budgeting / batch selection
# ---------------------------------------------------------------------------
def _vmem_capacity_bytes():
    """Per-core VMEM capacity; conservative fallback if the query fails."""
    try:
        return int(pltpu.get_tpu_info().vmem_capacity_bytes)
    except Exception:
        return 64 * 1024 * 1024       # v7x per-TensorCore size (smallest gen)


def _choose_batch(nc, h, w, in_itemsize, out_itemsize, vmem_budget):
    """Images per grid step: largest divisor of `nc` that
       (a) keeps the input-block second-to-last dim sublane-aligned,
       (b) fits the VMEM budget (double-buffered in/out blocks, f32
           intermediates, double-buffered filter matrices),
       (c) gives an even number of grid steps >= 2 (megacore balance on v7x),
       relaxing (c) when no divisor satisfies it."""
    hh, wh = h // 2, w // 2
    sublane = {4: 8, 2: 16, 1: 32}.get(in_itemsize, 8)

    def vmem_use(b):
        return (2 * 4 * b * hh * wh * in_itemsize      # 4 sub-band blocks, x2 buffers
                + 2 * b * h * w * out_itemsize         # output block, x2 buffers
                + 4 * b * h * w * 4                    # f32 intermediates
                + 2 * 2 * (wh * w + hh * h) * 4)       # filter matrices, x2 buffers

    def aligned(b):
        return (b * hh) % sublane == 0 or b == nc      # full-array block also ok

    divisors = [b for b in range(1, nc + 1) if nc % b == 0]
    for steps_ok in (lambda s: s >= 2 and s % 2 == 0,  # even steps, both cores busy
                     lambda s: s >= 2,                 # at least split the work
                     lambda s: True):                  # single big block
        cands = [b for b in divisors
                 if aligned(b) and vmem_use(b) <= vmem_budget and steps_ok(nc // b)]
        if cands:
            return max(cands)
    aligned_divs = [b for b in divisors if aligned(b)]
    return min(aligned_divs) if aligned_divs else nc   # degenerate fallback


# ---------------------------------------------------------------------------
# Wrapper
# ---------------------------------------------------------------------------
def idwt_2d(LL, LH, HL, HH, ml0, ml1, mh0, mh1):
    """(N,C,H/2,W/2) x4 sub-bands -> reconstructed (N,C,H,W)."""
    N, C, Hh, Wh = LL.shape
    H = ml0.shape[1]          # ml0 : (H/2, H)
    W = ml1.shape[0]          # ml1 : (W,  W/2)
    assert (Hh, Wh) == (H // 2, W // 2)
    # TODO(synk): pad/mask to support sizes violating these alignments.
    assert H % 16 == 0 and W % 8 == 0, "kernel assumes H % 16 == 0 and W % 8 == 0"
    NC = N * C

    # Free row-major reshapes -- no packing/concatenation (saves an HBM pass).
    llf = LL.reshape(NC * Hh, Wh)
    lhf = LH.reshape(NC * Hh, Wh)
    hlf = HL.reshape(NC * Hh, Wh)
    hhf = HH.reshape(NC * Hh, Wh)

    # Tiny filter-matrix prep (negligible).
    ml1t = ml1.T.astype(jnp.float32)      # (W/2, W)  = matrix_low_1.t()
    mh1t = mh1.T.astype(jnp.float32)      # (W/2, W)  = matrix_high_1.t()
    ml0f = ml0.astype(jnp.float32)        # (H/2, H)
    mh0f = mh0.astype(jnp.float32)        # (H/2, H)

    capacity = _vmem_capacity_bytes()
    vmem_budget = capacity // 3                           # data blocks + intermediates
    vmem_limit = min((capacity * 3) // 4, 96 * 1024 * 1024)
    itemsize = LL.dtype.itemsize
    B = _choose_batch(NC, H, W, itemsize, itemsize, vmem_budget)
    grid = (NC // B,)

    kernel = functools.partial(idwt2d_kernel, batch=B, height=H, width=W)

    out = pl.pallas_call(
        kernel,
        out_shape=jax.ShapeDtypeStruct((NC * H, W), LL.dtype),
        grid=grid,
        in_specs=[
            pl.BlockSpec((B * Hh, Wh), lambda i: (i, 0)),   # LL
            pl.BlockSpec((B * Hh, Wh), lambda i: (i, 0)),   # LH
            pl.BlockSpec((B * Hh, Wh), lambda i: (i, 0)),   # HL
            pl.BlockSpec((B * Hh, Wh), lambda i: (i, 0)),   # HH
            pl.BlockSpec((Wh, W), lambda i: (0, 0)),        # M_L1^T (grid-invariant)
            pl.BlockSpec((Wh, W), lambda i: (0, 0)),        # M_H1^T
            pl.BlockSpec((Hh, H), lambda i: (0, 0)),        # M_L0
            pl.BlockSpec((Hh, H), lambda i: (0, 0)),        # M_H0
        ],
        out_specs=pl.BlockSpec((B * H, W), lambda i: (i, 0)),
        compiler_params=pltpu.CompilerParams(
            dimension_semantics=("parallel",),
            vmem_limit_bytes=vmem_limit),
    )(llf, lhf, hlf, hhf, ml1t, mh1t, ml0f, mh0f)

    return out.reshape(N, C, H, W)


def idwt_2d_reference(LL, LH, HL, HH, ml0, ml1, mh0, mh1):
    """Pure-JAX replica of IDWTFunction_2D.forward."""
    L = jnp.matmul(LL, ml1.T) + jnp.matmul(LH, mh1.T)       # (N,C,H/2,W)
    Hc = jnp.matmul(HL, ml1.T) + jnp.matmul(HH, mh1.T)      # (N,C,H/2,W)
    return jnp.matmul(ml0.T, L) + jnp.matmul(mh0.T, Hc)     # (N,C,H,W)


if __name__ == "__main__":
    N, C, H, W = 2, 4, 16, 16
    key = jax.random.PRNGKey(0)
    k1, k2, k3, k4 = jax.random.split(key, 4)
    band_shape = (N, C, H // 2, W // 2)
    LL = jax.random.normal(k1, band_shape, dtype=jnp.float32)
    LH = jax.random.normal(k2, band_shape, dtype=jnp.float32)
    HL = jax.random.normal(k3, band_shape, dtype=jnp.float32)
    HH = jax.random.normal(k4, band_shape, dtype=jnp.float32)

    ml0_np, ml1_np, mh0_np, mh1_np = build_idwt_matrices(H, W)
    ml0 = jnp.asarray(ml0_np)
    ml1 = jnp.asarray(ml1_np)
    mh0 = jnp.asarray(mh0_np)
    mh1 = jnp.asarray(mh1_np)

    out = idwt_2d(LL, LH, HL, HH, ml0, ml1, mh0, mh1)
    out = jax.block_until_ready(out)

    ref = idwt_2d_reference(LL, LH, HL, HH, ml0, ml1, mh0, mh1)
    assert out.shape == (N, C, H, W)
    np.testing.assert_allclose(np.asarray(out), np.asarray(ref),
                               rtol=1e-5, atol=1e-5)

    print("KERNEL_OK")
</pallas_src>

<mosaic_0001>
module attributes {stable_mosaic.version = 11 : i64} {
  func.func @idwt2d_kernel(%arg0: i32, %arg1: memref<32x8xf32, #tpu.memory_space<vmem>>, %arg2: memref<32x8xf32, #tpu.memory_space<vmem>>, %arg3: memref<32x8xf32, #tpu.memory_space<vmem>>, %arg4: memref<32x8xf32, #tpu.memory_space<vmem>>, %arg5: memref<8x16xf32, #tpu.memory_space<vmem>>, %arg6: memref<8x16xf32, #tpu.memory_space<vmem>>, %arg7: memref<8x16xf32, #tpu.memory_space<vmem>>, %arg8: memref<8x16xf32, #tpu.memory_space<vmem>>, %arg9: memref<64x16xf32, #tpu.memory_space<vmem>>) attributes {dimension_semantics = [#tpu.dimension_semantics<parallel>], iteration_bounds = array<i64: 2>, scalar_prefetch = 0 : i64, scratch_operands = 0 : i64, tpu.core_type = #tpu.core_type<tc>, window_params = [{transform_indices = @transform_0, window_bounds = array<i64: 32, 8>}, {transform_indices = @transform_1, window_bounds = array<i64: 32, 8>}, {transform_indices = @transform_2, window_bounds = array<i64: 32, 8>}, {transform_indices = @transform_3, window_bounds = array<i64: 32, 8>}, {pipeline_mode = #tpu.pipeline_mode<synchronous>, transform_indices = @transform_4, window_bounds = array<i64: 8, 16>}, {pipeline_mode = #tpu.pipeline_mode<synchronous>, transform_indices = @transform_5, window_bounds = array<i64: 8, 16>}, {pipeline_mode = #tpu.pipeline_mode<synchronous>, transform_indices = @transform_6, window_bounds = array<i64: 8, 16>}, {pipeline_mode = #tpu.pipeline_mode<synchronous>, transform_indices = @transform_7, window_bounds = array<i64: 8, 16>}, {transform_indices = @transform_8, window_bounds = array<i64: 64, 16>}]} {
    %c0 = arith.constant 0 : index
    %c0_0 = arith.constant 0 : index
    %0 = vector.load %arg5[%c0, %c0_0] : memref<8x16xf32, #tpu.memory_space<vmem>>, vector<8x16xf32>
    %c0_1 = arith.constant 0 : index
    %c0_2 = arith.constant 0 : index
    %1 = vector.load %arg6[%c0_1, %c0_2] : memref<8x16xf32, #tpu.memory_space<vmem>>, vector<8x16xf32>
    %c0_3 = arith.constant 0 : index
    %c0_4 = arith.constant 0 : index
    %2 = vector.load %arg7[%c0_3, %c0_4] : memref<8x16xf32, #tpu.memory_space<vmem>>, vector<8x16xf32>
    %c0_5 = arith.constant 0 : index
    %c0_6 = arith.constant 0 : index
    %3 = vector.load %arg8[%c0_5, %c0_6] : memref<8x16xf32, #tpu.memory_space<vmem>>, vector<8x16xf32>
    %c0_7 = arith.constant 0 : index
    %c0_8 = arith.constant 0 : index
    %4 = vector.load %arg1[%c0_7, %c0_8] : memref<32x8xf32, #tpu.memory_space<vmem>>, vector<32x8xf32>
    %cst = arith.constant dense<0.000000e+00> : vector<32x16xf32>
    %5 = tpu.matmul %4, %0, %cst {dimension_numbers = #tpu.dot_dimension_numbers<[1], [0], [0], [1], [0, 0, 1, 1], [], []>} : vector<32x8xf32>, vector<8x16xf32>, vector<32x16xf32> -> vector<32x16xf32>
    %c0_9 = arith.constant 0 : index
    %c0_10 = arith.constant 0 : index
    %6 = vector.load %arg2[%c0_9, %c0_10] : memref<32x8xf32, #tpu.memory_space<vmem>>, vector<32x8xf32>
    %cst_11 = arith.constant dense<0.000000e+00> : vector<32x16xf32>
    %7 = tpu.matmul %6, %1, %cst_11 {dimension_numbers = #tpu.dot_dimension_numbers<[1], [0], [0], [1], [0, 0, 1, 1], [], []>} : vector<32x8xf32>, vector<8x16xf32>, vector<32x16xf32> -> vector<32x16xf32>
    %8 = arith.addf %5, %7 : vector<32x16xf32>
    %c0_12 = arith.constant 0 : index
    %c0_13 = arith.constant 0 : index
    %9 = vector.load %arg3[%c0_12, %c0_13] : memref<32x8xf32, #tpu.memory_space<vmem>>, vector<32x8xf32>
    %cst_14 = arith.constant dense<0.000000e+00> : vector<32x16xf32>
    %10 = tpu.matmul %9, %0, %cst_14 {dimension_numbers = #tpu.dot_dimension_numbers<[1], [0], [0], [1], [0, 0, 1, 1], [], []>} : vector<32x8xf32>, vector<8x16xf32>, vector<32x16xf32> -> vector<32x16xf32>
    %c0_15 = arith.constant 0 : index
    %c0_16 = arith.constant 0 : index
    %11 = vector.load %arg4[%c0_15, %c0_16] : memref<32x8xf32, #tpu.memory_space<vmem>>, vector<32x8xf32>
    %cst_17 = arith.constant dense<0.000000e+00> : vector<32x16xf32>
    %12 = tpu.matmul %11, %1, %cst_17 {dimension_numbers = #tpu.dot_dimension_numbers<[1], [0], [0], [1], [0, 0, 1, 1], [], []>} : vector<32x8xf32>, vector<8x16xf32>, vector<32x16xf32> -> vector<32x16xf32>
    %13 = arith.addf %10, %12 : vector<32x16xf32>
    %14 = vector.shape_cast %8 : vector<32x16xf32> to vector<4x8x16xf32>
    %15 = tpu.transpose %14, [0, 2, 1] : vector<4x8x16xf32> -> vector<4x16x8xf32>
    %16 = vector.shape_cast %13 : vector<32x16xf32> to vector<4x8x16xf32>
    %17 = tpu.transpose %16, [0, 2, 1] : vector<4x8x16xf32> -> vector<4x16x8xf32>
    %18 = vector.shape_cast %15 : vector<4x16x8xf32> to vector<64x8xf32>
    %19 = vector.shape_cast %17 : vector<4x16x8xf32> to vector<64x8xf32>
    %cst_18 = arith.constant dense<0.000000e+00> : vector<64x16xf32>
    %20 = tpu.matmul %18, %2, %cst_18 {dimension_numbers = #tpu.dot_dimension_numbers<[1], [0], [0], [1], [0, 0, 1, 1], [], []>} : vector<64x8xf32>, vector<8x16xf32>, vector<64x16xf32> -> vector<64x16xf32>
    %cst_19 = arith.constant dense<0.000000e+00> : vector<64x16xf32>
    %21 = tpu.matmul %19, %3, %cst_19 {dimension_numbers = #tpu.dot_dimension_numbers<[1], [0], [0], [1], [0, 0, 1, 1], [], []>} : vector<64x8xf32>, vector<8x16xf32>, vector<64x16xf32> -> vector<64x16xf32>
    %22 = arith.addf %20, %21 : vector<64x16xf32>
    %23 = vector.shape_cast %22 : vector<64x16xf32> to vector<4x16x16xf32>
    %24 = tpu.transpose %23, [0, 2, 1] : vector<4x16x16xf32> -> vector<4x16x16xf32>
    %25 = vector.shape_cast %24 : vector<4x16x16xf32> to vector<64x16xf32>
    %c0_20 = arith.constant 0 : index
    %c0_21 = arith.constant 0 : index
    %26 = vector.load %arg9[%c0_20, %c0_21] : memref<64x16xf32, #tpu.memory_space<vmem>>, vector<64x16xf32>
    tpu.vector_store %arg9[%c0_20, %c0_21], %25 {strides = array<i32>} : memref<64x16xf32, #tpu.memory_space<vmem>>, vector<64x16xf32>,
    return
  }
  func.func @transform_0(%arg0: i32) -> (i32, i32) {
    %c0_i32 = arith.constant 0 : i32
    %c0_i32_0 = arith.constant 0 : i32
    return %arg0, %c0_i32 : i32, i32
  }
  func.func @transform_1(%arg0: i32) -> (i32, i32) {
    %c0_i32 = arith.constant 0 : i32
    %c0_i32_0 = arith.constant 0 : i32
    return %arg0, %c0_i32 : i32, i32
  }
  func.func @transform_2(%arg0: i32) -> (i32, i32) {
    %c0_i32 = arith.constant 0 : i32
    %c0_i32_0 = arith.constant 0 : i32
    return %arg0, %c0_i32 : i32, i32
  }
  func.func @transform_3(%arg0: i32) -> (i32, i32) {
    %c0_i32 = arith.constant 0 : i32
    %c0_i32_0 = arith.constant 0 : i32
    return %arg0, %c0_i32 : i32, i32
  }
  func.func @transform_4(%arg0: i32) -> (i32, i32) {
    %c0_i32 = arith.constant 0 : i32
    %c0_i32_0 = arith.constant 0 : i32
    %c0_i32_1 = arith.constant 0 : i32
    return %c0_i32, %c0_i32_0 : i32, i32
  }
  func.func @transform_5(%arg0: i32) -> (i32, i32) {
    %c0_i32 = arith.constant 0 : i32
    %c0_i32_0 = arith.constant 0 : i32
    %c0_i32_1 = arith.constant 0 : i32
    return %c0_i32, %c0_i32_0 : i32, i32
  }
  func.func @transform_6(%arg0: i32) -> (i32, i32) {
    %c0_i32 = arith.constant 0 : i32
    %c0_i32_0 = arith.constant 0 : i32
    %c0_i32_1 = arith.constant 0 : i32
    return %c0_i32, %c0_i32_0 : i32, i32
  }
  func.func @transform_7(%arg0: i32) -> (i32, i32) {
    %c0_i32 = arith.constant 0 : i32
    %c0_i32_0 = arith.constant 0 : i32
    %c0_i32_1 = arith.constant 0 : i32
    return %c0_i32, %c0_i32_0 : i32, i32
  }
  func.func @transform_8(%arg0: i32) -> (i32, i32) {
    %c0_i32 = arith.constant 0 : i32
    %c0_i32_0 = arith.constant 0 : i32
    return %arg0, %c0_i32 : i32, i32
  }
}

</mosaic_0001>

<bundles_post_ra>
// kernel: tpu_custom_call.1
= control target key start
LH: loop header
LB: loop body
LE: loop exit
PB: predicated region body
PF: predicated region fallthrough
CT: control target
= control target key end

     0   :  { %s1286_s27 = smov 0   ;;  %s1368_s0 = inlined_call_operand.vmem [shape: f32[64,8], index: 0, kind: input, shape index: {}]   ;;  %s1369_s1 = inlined_call_operand.vmem [shape: f32[64,8], index: 1, kind: input, shape index: {}]   ;;  %s1370_s2 = inlined_call_operand.vmem [shape: f32[64,8], index: 2, kind: input, shape index: {}]   ;;  %s1371_s3 = inlined_call_operand.vmem [shape: f32[64,8], index: 3, kind: input, shape index: {}]   ;;  %s1372_s4 = inlined_call_operand.vmem [shape: f32[8,16], index: 4, kind: input, shape index: {}]   ;;  %s1373_s5 = inlined_call_operand.vmem [shape: f32[8,16], index: 5, kind: input, shape index: {}]   ;;  %s1374_s6 = inlined_call_operand.vmem [shape: f32[8,16], index: 6, kind: input, shape index: {}]   ;;  %s1375_s7 = inlined_call_operand.vmem [shape: f32[8,16], index: 7, kind: input, shape index: {}]   ;;  %s1376_s8 = inlined_call_operand.vmem [shape: f32[128,16], index: 8, kind: output, shape index: {}]  }
   0x1 LB: > { %s1175_s28 = sadd.s32 4294967295, %s1239_s27   ;;  %p1179_p0 = scmp.ge.s32.totalorder %s1239_s27, 1  ;;  %s1239_s27 = sphi %s1286_s27, %s18_s27  }
   0x2   : > { %p296_p1 = scmp.lt.s32.totalorder %s1239_s27, 3 }
   0x4   : > { %p297_p2 = pnand %p1179_p0, %p296_p1 }
   0x5   : > { %s1180_s11 = sshll.u32 (!%p297_p2), %s1175_s28, 2  ;;  %s1188_s9 = sshll.u32 (!%p297_p2), %s1175_s28, 3 }
   0x6   : > { %300 = sbr.rel (%p297_p2) target bundleno = 686 (0x2ae), region = 52  ;;  %p346_p3 = scmp.lt.s32.totalorder (!%p297_p2), %s1180_s11, 7 }
   0x7   : > { %p370_p4 = scmp.lt.s32.totalorder (!%p297_p2), %s1188_s9, 15 }
   0xb   : > { %v376_v0 = vld [vmem:[%s1373_s5] sm:$0xff]  ;;  %s1378_s11 = smov (!%p346_p3, %s1180_s11), 7  ;;  %vm387_vm0 = vcmask 64512   ;;  %s1380_s9 = smov (!%p370_p4, %s1188_s9), 15  ;;  %vm1074_vm1 = vcmask 130048  }
   0xc   : > { %v375_v1 = vld [vmem:[%s1372_s4] sm:$0xff]  ;;  %415 = vmatpush.msra.mxu2 %v376_v0  ;;  %s1181_s12 = sshll.u32 %s1378_s11, 3  ;;  %s1189_s10 = sshll.u32 %s1380_s9, 3 }
   0xd   : > { %456 = vmatpush.msra.mxu3 %v375_v1  ;;  %s355_s15 = scalar_lea.vmem %s1369_s1, %s1181_s12  ;;  %s349_s18 = scalar_lea.vmem %s1368_s0, %s1181_s12  ;;  %v377_v29 = vld [vmem:[%s1374_s6] sm:$0xff] }
   0xe   : > { %505 = vmatpush.msrb.mxu2 %v376_v0  ;;  %v383_v2 = vld [vmem:[%s355_s15] sm:$0xff]  ;;  %v384_v4 = vld [vmem:[%s355_s15 + $0x8] sm:$0xff]  ;;  %v385_v6 = vld [vmem:[%s355_s15 + $0x10] sm:$0xff]  ;;  %s367_s21 = scalar_lea.vmem %s1371_s3, %s1181_s12  ;;  %s361_s24 = scalar_lea.vmem %s1370_s2, %s1181_s12  ;;  %920 = vmatpush.msra.mxu1 %v377_v29 }
   0xf   : > { %546 = vmatpush.msrb.mxu3 %v375_v1  ;;  %v379_v3 = vld [vmem:[%s349_s18] sm:$0xff]  ;;  %1190 = vmatmul.msk.f32.vlgmr.msra.gmra.mxu2 %vm387_vm0, %v383_v2  ;;  %v380_v5 = vld [vmem:[%s349_s18 + $0x8] sm:$0xff]  ;;  %v381_v7 = vld [vmem:[%s349_s18 + $0x10] sm:$0xff]  ;;  %s373_s13 = scalar_lea.vmem %s1376_s8, %s1189_s10 }
  0x10   : > { %1194 = vmatmul.msk.f32.vlgmr.msra.gmra.mxu3 %vm387_vm0, %v379_v3  ;;  %v386_v8 = vld [vmem:[%s355_s15 + $0x18] sm:$0xff]  ;;  %v474_v10 = vld [vmem:[%s367_s21] sm:$0xff]  ;;  %v475_v12 = vld [vmem:[%s367_s21 + $0x8] sm:$0xff] }
  0x11   : > { %v382_v9 = vld [vmem:[%s349_s18 + $0x18] sm:$0xff]  ;;  %v470_v11 = vld [vmem:[%s361_s24] sm:$0xff]  ;;  %v471_v13 = vld [vmem:[%s361_s24 + $0x8] sm:$0xff] }
  0x12   : > { %v476_v14 = vld [vmem:[%s367_s21 + $0x10] sm:$0xff]  ;;  %v477_v16 = vld [vmem:[%s367_s21 + $0x18] sm:$0xff]  ;;  %v378_v43 = vld [vmem:[%s1375_s7] sm:$0xff] }
  0x13   : > { %v472_v15 = vld [vmem:[%s361_s24 + $0x10] sm:$0xff]  ;;  %v473_v17 = vld [vmem:[%s361_s24 + $0x18] sm:$0xff]  ;;  %855 = vmatpush.msra.mxu0 %v378_v43 }
  0x17   : > { %1191 = vmatmul.msk.f32.gmra.mxu2 %vm387_vm0, %v384_v4 }
  0x18   : > { %1195 = vmatmul.msk.f32.gmra.mxu3 %vm387_vm0, %v380_v5 }
  0x1f   : > { %1192 = vmatmul.msk.f32.gmra.mxu2 %vm387_vm0, %v385_v6 }
  0x20   : > { %1196 = vmatmul.msk.f32.gmra.mxu3 %vm387_vm0, %v381_v7 }
  0x27   : > { %1193 = vmatmul.msk.f32.gmra.mxu2 %vm387_vm0, %v386_v8 }
  0x28   : > { %1197 = vmatmul.msk.f32.gmra.mxu3 %vm387_vm0, %v382_v9 }
  0x2f   : > { %1198 = vmatmul.msk.f32.vlgmr.msrb.gmra.mxu2 %vm387_vm0, %v474_v10 }
  0x30   : > { %1202 = vmatmul.msk.f32.vlgmr.msrb.gmra.mxu3 %vm387_vm0, %v470_v11 }
  0x37   : > { %1199 = vmatmul.msk.f32.gmra.mxu2 %vm387_vm0, %v475_v12 }
  0x38   : > { %1203 = vmatmul.msk.f32.gmra.mxu3 %vm387_vm0, %v471_v13 }
  0x3f   : > { %1200 = vmatmul.msk.f32.gmra.mxu2 %vm387_vm0, %v476_v14 }
  0x40   : > { %1204 = vmatmul.msk.f32.gmra.mxu3 %vm387_vm0, %v472_v15 }
  0x47   : > { %1201 = vmatmul.msk.f32.gmra.mxu2 %vm387_vm0, %v477_v16 }
  0x48   : > { %1205 = vmatmul.msk.f32.gmra.mxu3 %vm387_vm0, %v473_v17 }
  0x92   : > { %v417_v18 = vpop.f32.mrf.mxu2 }
  0x93   : > { %v458_v19 = vpop.f32.mrf.mxu3 }
  0x94   : > { %v459_v20 = vadd.f32 %v458_v19, %v417_v18 }
  0x96   : > { %560 = vxpose.xlu0.b32.start.end [1/1] (short) (narrow) %v459_v20, 16 }
  0x9a   : > { %v420_v21 = vpop.f32.mrf.mxu2 }
  0x9b   : > { %v461_v22 = vpop.f32.mrf.mxu3 }
  0x9c   : > { %v462_v23 = vadd.f32 %v461_v22, %v420_v21 }
  0x9e   : > { %592 = vxpose.xlu1.b32.start.end [1/1] (short) (narrow) %v462_v23, 16 }
  0xa2   : > { %v423_v24 = vpop.f32.mrf.mxu2 }
  0xa3   : > { %v464_v25 = vpop.f32.mrf.mxu3 }
  0xa4   : > { %v465_v26 = vadd.f32 %v464_v25, %v423_v24 }
  0xa6   : > { %624 = vxpose.xlu2.b32.start.end [1/1] (short) (narrow) %v465_v26, 16 }
  0xaa   : > { %v426_v27 = vpop.f32.mrf.mxu2 }
  0xab   : > { %v467_v28 = vpop.f32.mrf.mxu3 }
  0xac   : > { %v468_v38 = vadd.f32 %v467_v28, %v426_v27 }
  0xb2   : > { %v507_v30 = vpop.f32.mrf.mxu2 }
  0xb3   : > { %v548_v31 = vpop.f32.mrf.mxu3 }
  0xb4   : > { %v549_v32 = vadd.f32 %v548_v31, %v507_v30 }
  0xb6   : > { %688 = vxpose.xlu0.b32.start.end [1/1] (short) (narrow) %v549_v32, 16 }
  0xba   : > { %v510_v33 = vpop.f32.mrf.mxu2 }
  0xbb   : > { %v551_v34 = vpop.f32.mrf.mxu3 }
  0xbc   : > { %v552_v35 = vadd.f32 %v551_v34, %v510_v33 }
  0xbe   : > { %720 = vxpose.xlu1.b32.start.end [1/1] (short) (narrow) %v552_v35, 16 }
  0xc2   : > { %v513_v36 = vpop.f32.mrf.mxu2 }
  0xc3   : > { %v554_v37 = vpop.f32.mrf.mxu3 }
  0xc4   : > { %v555_v39 = vadd.f32 %v554_v37, %v513_v36 }
  0xc6   : > { %656 = vxpose.xlu0.b32.start.end [1/1] (short) (narrow) %v468_v38, 16  ;;  %752 = vxpose.xlu2.b32.start.end [1/1] (short) (narrow) %v555_v39, 16 }
  0xca   : > { %v516_v40 = vpop.f32.mrf.mxu2 }
  0xcb   : > { %v557_v41 = vpop.f32.mrf.mxu3 }
  0xcc   : > { %v558_v42 = vadd.f32 %v557_v41, %v516_v40 }
  0xce   : > { %784 = vxpose.xlu1.b32.start.end [1/1] (short) (narrow) %v558_v42, 16 }
 0x13a   : > { %v576_v44 = vpop.trf.xlu0 }
 0x13b   : > { %1214 = vmatmul.msk.f32.vlgmr.msra.gmra.mxu1 %vm387_vm0, %v576_v44 }
 0x13f   : > { %v640_v48 = vpop.trf.xlu2 }
 0x142   : > { %v577_v45 = vpop.trf.xlu0  ;;  %v608_v46 = vpop.trf.xlu1 }
 0x143   : > { %1215 = vmatmul.msk.f32.gmra.mxu1 %vm387_vm0, %v577_v45 }
 0x147   : > { %v641_v50 = vpop.trf.xlu2 }
 0x14a   : > { %v609_v47 = vpop.trf.xlu1 }
 0x14b   : > { %1216 = vmatmul.msk.f32.gmra.mxu1 %vm387_vm0, %v608_v46 }
 0x153   : > { %1217 = vmatmul.msk.f32.gmra.mxu1 %vm387_vm0, %v609_v47 }
 0x15a   : > { %v704_v49 = vpop.trf.xlu0 }
 0x15b   : > { %1206 = vmatmul.msk.f32.vlgmr.msra.gmra.mxu0 %vm387_vm0, %v704_v49  ;;  %1218 = vmatmul.msk.f32.gmra.mxu1 %vm387_vm0, %v640_v48 }
 0x15f   : > { %v768_v56 = vpop.trf.xlu2 }
 0x162   : > { %v705_v51 = vpop.trf.xlu0  ;;  %v736_v52 = vpop.trf.xlu1 }
 0x163   : > { %1207 = vmatmul.msk.f32.gmra.mxu0 %vm387_vm0, %v705_v51  ;;  %1219 = vmatmul.msk.f32.gmra.mxu1 %vm387_vm0, %v641_v50 }
 0x167   : > { %v769_v57 = vpop.trf.xlu2 }
 0x16a   : > { %v672_v53 = vpop.trf.xlu0  ;;  %v737_v54 = vpop.trf.xlu1 }
 0x16b   : > { %1208 = vmatmul.msk.f32.gmra.mxu0 %vm387_vm0, %v736_v52  ;;  %1220 = vmatmul.msk.f32.gmra.mxu1 %vm387_vm0, %v672_v53 }
 0x172   : > { %v673_v55 = vpop.trf.xlu0  ;;  %v800_v58 = vpop.trf.xlu1 }
 0x173   : > { %1209 = vmatmul.msk.f32.gmra.mxu0 %vm387_vm0, %v737_v54  ;;  %1221 = vmatmul.msk.f32.gmra.mxu1 %vm387_vm0, %v673_v55 }
 0x17a   : > { %v801_v59 = vpop.trf.xlu1 }
 0x17b   : > { %1210 = vmatmul.msk.f32.gmra.mxu0 %vm387_vm0, %v768_v56 }
 0x183   : > { %1211 = vmatmul.msk.f32.gmra.mxu0 %vm387_vm0, %v769_v57 }
 0x18b   : > { %1212 = vmatmul.msk.f32.gmra.mxu0 %vm387_vm0, %v800_v58 }
 0x193   : > { %1213 = vmatmul.msk.f32.gmra.mxu0 %vm387_vm0, %v801_v59 }
 0x1b8   : > { %v922_v60 = vpop.f32.mrf.mxu1 }
 0x1c0   : > { %v925_v61 = vpop.f32.mrf.mxu1 }
 0x1c8   : > { %v928_v0 = vpop.f32.mrf.mxu1 }
 0x1d0   : > { %v931_v3 = vpop.f32.mrf.mxu1 }
 0x1d8   : > { %v857_v62 = vpop.f32.mrf.mxu0  ;;  %v934_v8 = vpop.f32.mrf.mxu1 }
 0x1d9   : > { %v923_v63 = vadd.f32 %v922_v60, %v857_v62 }
 0x1db   : > { %946 = vxpose.xlu2.b32.start [1/2] (short) (narrow) %v923_v63, 16 }
 0x1e0   : > { %v860_v1 = vpop.f32.mrf.mxu0  ;;  %v937_v11 = vpop.f32.mrf.mxu1 }
 0x1e1   : > { %v926_v2 = vadd.f32 %v925_v61, %v860_v1 }
 0x1e3   : > { %947 = vxpose.xlu2.b32.end [2/2] (short) (narrow) %v926_v2, 16 }
 0x1e8   : > { %v863_v4 = vpop.f32.mrf.mxu0  ;;  %v940_v14 = vpop.f32.mrf.mxu1 }
 0x1e9   : > { %v929_v5 = vadd.f32 %v928_v0, %v863_v4 }
 0x1eb   : > { %978 = vxpose.xlu0.b32.start [1/2] (short) (narrow) %v929_v5, 16 }
 0x1f0   : > { %v866_v6 = vpop.f32.mrf.mxu0  ;;  %v943_v17 = vpop.f32.mrf.mxu1 }
 0x1f1   : > { %v932_v7 = vadd.f32 %v931_v3, %v866_v6 }
 0x1f3   : > { %979 = vxpose.xlu0.b32.end [2/2] (short) (narrow) %v932_v7, 16 }
 0x1f8   : > { %v869_v9 = vpop.f32.mrf.mxu0 }
 0x1f9   : > { %v935_v10 = vadd.f32 %v934_v8, %v869_v9 }
 0x1fb   : > { %1010 = vxpose.xlu1.b32.start [1/2] (short) (narrow) %v935_v10, 16 }
 0x200   : > { %v872_v12 = vpop.f32.mrf.mxu0 }
 0x201   : > { %v938_v13 = vadd.f32 %v937_v11, %v872_v12 }
 0x203   : > { %1011 = vxpose.xlu1.b32.end [2/2] (short) (narrow) %v938_v13, 16 }
 0x208   : > { %v875_v15 = vpop.f32.mrf.mxu0 }
 0x209   : > { %v941_v16 = vadd.f32 %v940_v14, %v875_v15 }
 0x20b   : > { %1042 = vxpose.xlu2.b32.start [1/2] (short) (narrow) %v941_v16, 16 }
 0x210   : > { %v878_v18 = vpop.f32.mrf.mxu0 }
 0x211   : > { %v944_v19 = vadd.f32 %v943_v17, %v878_v18 }
 0x213   : > { %1043 = vxpose.xlu2.b32.end [2/2] (short) (narrow) %v944_v19, 16 }
 0x274   : > { %v962_v20 = vpop.trf.xlu2 }
 0x275   : > { %1075 = vst.msk [vmem:[%s373_s13] sm:$0xff] %vm1074_vm1, %v962_v20 }
 0x27c   : > { %v963_v21 = vpop.trf.xlu2 }
 0x27d   : > { %1076 = vst.msk [vmem:[%s373_s13 + $0x8] sm:$0xff] %vm1074_vm1, %v963_v21 }
 0x28f   : > { %v994_v22 = vpop.trf.xlu0 }
 0x290   : > { %1077 = vst.msk [vmem:[%s373_s13 + $0x10] sm:$0xff] %vm1074_vm1, %v994_v22 }
 0x297   : > { %v995_v23 = vpop.trf.xlu0 }
 0x298   : > { %1078 = vst.msk [vmem:[%s373_s13 + $0x18] sm:$0xff] %vm1074_vm1, %v995_v23 }
 0x29f   : > { %v1026_v24 = vpop.trf.xlu1 }
 0x2a0   : > { %1079 = vst.msk [vmem:[%s373_s13 + $0x20] sm:$0xff] %vm1074_vm1, %v1026_v24 }
 0x2a4   : > { %v1058_v25 = vpop.trf.xlu2 }
 0x2a5   : > { %1081 = vst.msk [vmem:[%s373_s13 + $0x30] sm:$0xff] %vm1074_vm1, %v1058_v25 }
 0x2a7   : > { %v1027_v26 = vpop.trf.xlu1 }
 0x2a8   : > { %1080 = vst.msk [vmem:[%s373_s13 + $0x28] sm:$0xff] %vm1074_vm1, %v1027_v26 }
 0x2ac   : > { %v1059_v27 = vpop.trf.xlu2 }
 0x2ad   : > { %1082 = vst.msk [vmem:[%s373_s13 + $0x38] sm:$0xff] %vm1074_vm1, %v1059_v27 }
 0x2ae PF: > { %s18_s27 = sadd.s32 1, %s1239_s27  }
 0x2af   : > { %p15_p5 = scmp.ge.s32.totalorder %s18_s27, 4  }
 0x2b1   :  { %17 = sbr.rel (!%p15_p5) target bundleno = 1 (0x1), region = 91 }

</bundles_post_ra>
